<compile_context>
chip_gen: v6e
topology: v6e:2x2x1
jax: 0.10.0
libtpu: 0.0.40
codegen_flags: <defaults>
</compile_context>

<pallas_src>
import functools

import jax
import jax.numpy as jnp
from jax.experimental import pallas as pl
from jax.experimental.pallas import tpu as pltpu


def _round_up(x, m):
    return ((x + m - 1) // m) * m


def _sublane_multiple(dtype):
    # 8 rows/sublane-tile for 32-bit, 16 for 16-bit, 32 for 8-bit dtypes.
    itemsize = jnp.dtype(dtype).itemsize
    return max(8, 32 // itemsize)


def _linear_kernel(x_ref, w_ref, b_ref, o_ref):
    # x tile: (bn, D); w: (D, OUT); b: (1, OUT) f32; o: (bn, OUT)
    acc = jnp.dot(x_ref[...], w_ref[...], preferred_element_type=jnp.float32)
    acc = acc + b_ref[...]  # bias is already f32; broadcasts over rows
    o_ref[...] = acc.astype(o_ref.dtype)


@functools.partial(jax.jit, static_argnames=("vmem_budget_bytes",))
def regresion_lineal(x, weight, bias, *, vmem_budget_bytes=32 * 1024 * 1024):
    """x: (N, D); weight: (OUT, D) [PyTorch layout]; bias: (OUT,). Returns (N, OUT)."""
    N, D = x.shape
    out_features = weight.shape[0]

    # Promote (never truncate) to a common compute dtype; f32/f32 is a no-op.
    compute_dtype = jnp.promote_types(x.dtype, weight.dtype)
    x_c = x.astype(compute_dtype)
    w_t = weight.T.astype(compute_dtype)                       # (D, OUT)
    b2 = bias.reshape(1, out_features).astype(jnp.float32)     # f32 add path

    dsize = jnp.dtype(compute_dtype).itemsize
    sub = _sublane_multiple(compute_dtype)

    # --- Row-tile size from an explicit VMEM budget -------------------------
    # Double-buffered x tile + double-buffered output tile per row, plus the
    # (worst case double-buffered) resident W and bias blocks.
    per_row = 2 * D * dsize + 2 * out_features * dsize
    resident = 2 * (D * out_features * dsize + out_features * 4)
    budget = max(vmem_budget_bytes - resident, per_row * sub)
    bn = max(sub, (budget // per_row) // sub * sub)

    n_pad = _round_up(N, sub)
    bn = min(bn, n_pad)
    # Prefer >= 2 grid steps so "parallel" can shard across v7x's two
    # TensorCores (harmless on single-TC v5e/v6e).
    if n_pad > sub and bn >= n_pad:
        bn = _round_up(pl.cdiv(N, 2), sub)
    grid = (pl.cdiv(N, bn),)

    vmem_estimate = per_row * bn + resident + (1 << 20)
    vmem_limit = int(min(48 << 20, max(32 << 20, vmem_estimate + (4 << 20))))

    cost = pl.CostEstimate(
        flops=2 * N * D * out_features,
        transcendentals=0,
        bytes_accessed=(N * D * dsize
                        + N * out_features * dsize
                        + D * out_features * dsize
                        + out_features * 4),
    )

    # NOTE: W and bias index_maps are constant across the grid, so their blocks
    # are never re-DMA'd; only the (small) double-buffer allocation remains.
    out = pl.pallas_call(
        _linear_kernel,
        out_shape=jax.ShapeDtypeStruct((N, out_features), compute_dtype),
        grid_spec=pltpu.PrefetchScalarGridSpec(
            num_scalar_prefetch=0,
            grid=grid,
            in_specs=[
                pl.BlockSpec((bn, D), lambda i: (i, 0)),              # x row tile
                pl.BlockSpec((D, out_features), lambda i: (0, 0)),    # W (resident)
                pl.BlockSpec((1, out_features), lambda i: (0, 0)),    # bias (resident)
            ],
            out_specs=pl.BlockSpec((bn, out_features), lambda i: (i, 0)),
        ),
        compiler_params=pltpu.CompilerParams(
            dimension_semantics=("parallel",),
            vmem_limit_bytes=vmem_limit,
        ),
        cost_estimate=cost,
    )(x_c, w_t, b2)

    return out


def init_params(key, input_dim, out_features=6, dtype=jnp.float32):
    """Deterministic init mimicking nn.Linear default (uniform +/- 1/sqrt(D))."""
    k1, k2 = jax.random.split(key)
    bound = 1.0 / jnp.sqrt(jnp.asarray(input_dim, dtype))
    weight = jax.random.uniform(k1, (out_features, input_dim), dtype, -bound, bound)
    bias = jax.random.uniform(k2, (out_features,), dtype, -bound, bound)
    return weight, bias


if __name__ == "__main__":
    batch, input_dim = 8, 32

    key = jax.random.PRNGKey(0)
    kx, kp = jax.random.split(key)
    x = jax.random.normal(kx, (batch, input_dim), dtype=jnp.float32)
    weight, bias = init_params(kp, input_dim, out_features=6)

    out = regresion_lineal(x, weight, bias)
    out = jax.block_until_ready(out)

    # Pure-JAX reference for sanity.
    ref = x @ weight.T + bias
    assert out.shape == (batch, 6), out.shape
    assert jnp.allclose(out, ref, atol=1e-5, rtol=1e-5), (out, ref)

    print("KERNEL_OK")
</pallas_src>

<mosaic_0001>
module attributes {stable_mosaic.version = 11 : i64} {
  func.func @_linear_kernel(%arg0: i32, %arg1: memref<8x32xf32, #tpu.memory_space<vmem>>, %arg2: memref<32x6xf32, #tpu.memory_space<vmem>>, %arg3: memref<1x6xf32, #tpu.memory_space<vmem>>, %arg4: memref<8x6xf32, #tpu.memory_space<vmem>>) attributes {dimension_semantics = [#tpu.dimension_semantics<parallel>], iteration_bounds = array<i64: 1>, scalar_prefetch = 0 : i64, scratch_operands = 0 : i64, tpu.core_type = #tpu.core_type<tc>, window_params = [{transform_indices = @transform_0, window_bounds = array<i64: 8, 32>}, {pipeline_mode = #tpu.pipeline_mode<synchronous>, transform_indices = @transform_1, window_bounds = array<i64: 32, 6>}, {pipeline_mode = #tpu.pipeline_mode<synchronous>, transform_indices = @transform_2, window_bounds = array<i64: 1, 6>}, {transform_indices = @transform_3, window_bounds = array<i64: 8, 6>}]} {
    %c0 = arith.constant 0 : index
    %c0_0 = arith.constant 0 : index
    %0 = vector.load %arg1[%c0, %c0_0] : memref<8x32xf32, #tpu.memory_space<vmem>>, vector<8x32xf32>
    %c0_1 = arith.constant 0 : index
    %c0_2 = arith.constant 0 : index
    %1 = vector.load %arg2[%c0_1, %c0_2] : memref<32x6xf32, #tpu.memory_space<vmem>>, vector<32x6xf32>
    %cst = arith.constant dense<0.000000e+00> : vector<8x6xf32>
    %2 = tpu.matmul %0, %1, %cst {dimension_numbers = #tpu.dot_dimension_numbers<[1], [0], [0], [1], [0, 0, 1, 1], [], []>} : vector<8x32xf32>, vector<32x6xf32>, vector<8x6xf32> -> vector<8x6xf32>
    %c0_3 = arith.constant 0 : index
    %c0_4 = arith.constant 0 : index
    %3 = vector.load %arg3[%c0_3, %c0_4] : memref<1x6xf32, #tpu.memory_space<vmem>>, vector<1x6xf32>
    %4 = vector.broadcast %3 : vector<1x6xf32> to vector<8x6xf32>
    %5 = arith.addf %2, %4 : vector<8x6xf32>
    %c0_5 = arith.constant 0 : index
    %c0_6 = arith.constant 0 : index
    %6 = vector.load %arg4[%c0_5, %c0_6] : memref<8x6xf32, #tpu.memory_space<vmem>>, vector<8x6xf32>
    tpu.vector_store %arg4[%c0_5, %c0_6], %5 {strides = array<i32>} : memref<8x6xf32, #tpu.memory_space<vmem>>, vector<8x6xf32>,
    return
  }
  func.func @transform_0(%arg0: i32) -> (i32, i32) {
    %c0_i32 = arith.constant 0 : i32
    %c0_i32_0 = arith.constant 0 : i32
    return %arg0, %c0_i32 : i32, i32
  }
  func.func @transform_1(%arg0: i32) -> (i32, i32) {
    %c0_i32 = arith.constant 0 : i32
    %c0_i32_0 = arith.constant 0 : i32
    %c0_i32_1 = arith.constant 0 : i32
    return %c0_i32, %c0_i32_0 : i32, i32
  }
  func.func @transform_2(%arg0: i32) -> (i32, i32) {
    %c0_i32 = arith.constant 0 : i32
    %c0_i32_0 = arith.constant 0 : i32
    %c0_i32_1 = arith.constant 0 : i32
    return %c0_i32, %c0_i32_0 : i32, i32
  }
  func.func @transform_3(%arg0: i32) -> (i32, i32) {
    %c0_i32 = arith.constant 0 : i32
    %c0_i32_0 = arith.constant 0 : i32
    return %arg0, %c0_i32 : i32, i32
  }
}

</mosaic_0001>

<bundles_post_ra>
// kernel: regresion_lineal.1
= control target key start
LH: loop header
LB: loop body
LE: loop exit
PB: predicated region body
PF: predicated region fallthrough
CT: control target
= control target key end

     0   :  { %v160_v1 = vmov 0.0   ;;  %vm161_vm0 = vmmov 0   ;;  %s204_s0 = inlined_call_operand.vmem [shape: f32[8,32], index: 0, kind: input, shape index: {}]   ;;  %s205_s1 = inlined_call_operand.vmem [shape: f32[32,6], index: 1, kind: input, shape index: {}]   ;;  %s206_s2 = inlined_call_operand.vmem [shape: f32[1,6], index: 2, kind: input, shape index: {}]   ;;  %s207_s3 = inlined_call_operand.hbm [shape: f32[8,6], index: 3, kind: output, shape index: {}]  }
   0x1   :  { %v19_v0 = vld [vmem:[%s205_s1 + $0x18] sm:$0xff]  ;;  %124 = vmatprep.subr.mxu0 %v160_v1  ;;  %v18_v2 = vld [vmem:[%s205_s1 + $0x10] sm:$0xff]  ;;  %132 = vmatprep.mubr.msk.f32.mxu0 %vm161_vm0, %v160_v1 }
   0x2   :  { %125 = vmatpush3.msra.mxu0 %v19_v0 }
   0x3   :  { %8 = vsyncpa [#allocation3], 0  ;;  %126 = vmatprep.subr.mxu0 %v160_v1  ;;  %v17_v3 = vld [vmem:[%s205_s1 + $0x8] sm:$0xff]  ;;  %v16_v4 = vld [vmem:[%s205_s1] sm:$0xff]  ;;  %vm27_vm1 = vcmask 261120   ;;  %s162_s24 = smov [#allocation2]  }
   0x4   :  { %127 = vmatpush3.msra.mxu0 %v18_v2  ;;  %v15_v5 = vld [vmem:[%s204_s0] sm:$0xff]  ;;  %s109_s25 = sshll.u32 %s162_s24, 4  ;;  %vm101_vm2 = vcmask 48128   ;;  %s110_s25 = int_to_ptr.vmem [resolvable:$true] %s109_s25 }
   0x5   :  { %128 = vmatprep.subr.mxu0 %v160_v1  ;;  %v117_v6 = vld [vmem:[%s206_s2] ss:$0 sm:$0xff]  ;;  %s138_s1 = scalar_lea.vmem %s110_s25, 128  ;;  %p143_p1 = scmp.lt.s32.totalorder %s110_s25, %s110_s25 }
   0x6   :  { %129 = vmatpush3.msra.mxu0 %v17_v3  ;;  %p139_p0 = scmp.ne.s32.totalorder %s110_s25, %s138_s1  ;;  %p144_p2 = scmp.lt.s32.totalorder %s138_s1, %s138_s1 }
   0x7   :  { %130 = vmatprep.subr.mxu0 %v160_v1 }
   0x8   :  { %131 = vmatpush3.msra.mxu0 %v16_v4  ;;  %p145_p3 = por %p144_p2, %p143_p1 }
   0x9   :  { %133 = vmatmul.mubr.msk.f32.vlgmr.msra.gmra.mxu0 %vm27_vm1, %v15_v5 }
   0xa   :  { %p146_p4 = pnand %p145_p3, %p139_p0 }
  0xc9   :  { %v97_v7 = vpop.f32.mrf.mxu0 }
  0xca   :  { %v98_v8 = vadd.f32 %v117_v6, %v97_v7 }
  0xcb   :  { %v134_v9 = vpop.f32.mrf.mxu0 }
  0xcc   :  { %102 = vst.msk [vmem:[#allocation2] sm:$0xff] %vm101_vm2, %v98_v8 }
  0xcd   :  { %149 = shalt.err (!%p146_p4)
}
  0xce   :  { %112 = dma.vmem_to_hbm [thread:$0]  %s110_s25, 128, %s207_s3, [#allocation3]  }
  0xcf   :  { %158 = dma.done.wait [#allocation3], 128  }
  0xd0   :  { %159 = vsyncadd [#allocation3], 4294967168 }
  0xd1   :  { %116 = vsyncpa [#allocation3], 1 }

</bundles_post_ra>
